<compile_context>
chip_gen: v6e
topology: v6e:2x2x1
jax: 0.10.0
libtpu: 0.0.40
codegen_flags: <defaults>
</compile_context>

<pallas_src>
import math

import jax
import jax.numpy as jnp
from jax.experimental import pallas as pl
from jax.experimental.pallas import tpu as pltpu

_LANES = 128
_MAX_SLAB_WIDTH = 2048                 # cap on lcm(dim,128) slab width (16 vregs/row)
_OUT_BUFFER_BYTES = 8 * 1024 * 1024    # per output buffer (Pallas double-buffers it)
_VMEM_LIMIT_BYTES = 32 * 1024 * 1024   # 2 x 8 MiB out buffers + headroom, all gens


def _emb_kernel(ab_ref, out_ref):
    """out[r, c] = (row0 + r) * a[c] + b[c].

    ab_ref: (2, W) f32 with row 0 = a, row 1 = b (constant index_map -> DMA'd
    once, stays resident).  Per output vreg: iota, cvt, mul, add (4 VALU ops).
    """
    tile_rows = out_ref.shape[0]
    a = ab_ref[0:1, :]                                          # (1, W)
    row0 = (pl.program_id(0) * tile_rows).astype(jnp.float32)
    c = row0 * a + ab_ref[1:2, :]                               # (1, W) per-step const
    t = jax.lax.broadcasted_iota(jnp.int32, out_ref.shape, 0).astype(jnp.float32)
    out_ref[...] = t * a + c


def sinusoidal_embeddings(x: jax.Array, inv_freq: jax.Array) -> jax.Array:
    """JAX wrapper: x [..., n, d_any], inv_freq (dim//2,) -> emb (1, n, dim) f32."""
    n = x.shape[-2]
    half = inv_freq.shape[0]
    dim = 2 * half
    assert n * dim < 2 ** 31, "flat index must fit in int32"

    inv_full = jnp.concatenate([inv_freq, inv_freq]).astype(jnp.float32)   # (dim,)

    # Lane-dense slab width: smallest common multiple of dim and 128, unless it
    # would be unreasonably wide (rare awkward dims) -> fall back to natural width.
    lcm = dim * _LANES // math.gcd(dim, _LANES)
    slab_w = lcm if lcm <= max(_MAX_SLAB_WIDTH, dim) else dim
    k = slab_w // dim                      # sequence positions per flat slab row
    flat_rows = -(-n // k)                 # ceil(n / k); padded tail sliced below

    # Precompute a[c] = k * inv[c % dim], b[c] = (c // dim) * inv[c % dim].
    inv_tiled = jnp.tile(inv_full, k)                                      # (slab_w,)
    col = jnp.arange(slab_w, dtype=jnp.int32)
    a_vec = jnp.float32(k) * inv_tiled
    b_vec = (col // dim).astype(jnp.float32) * inv_tiled
    ab = jnp.stack([a_vec, b_vec]).astype(jnp.float32)                     # (2, slab_w)

    # Tile the flat-row axis; ~8 MiB output buffers amortize per-step overhead.
    budget_rows = max(8, _OUT_BUFFER_BYTES // (slab_w * 4))
    tile_rows = min(flat_rows, budget_rows)
    if tile_rows < flat_rows:
        tile_rows = max(8, (tile_rows // 8) * 8)
    grid = (pl.cdiv(flat_rows, tile_rows),)

    cost = pl.CostEstimate(
        flops=2 * flat_rows * slab_w,
        transcendentals=0,
        bytes_accessed=flat_rows * slab_w * 4 + 2 * slab_w * 4,
    )

    emb_flat = pl.pallas_call(
        _emb_kernel,
        out_shape=jax.ShapeDtypeStruct((flat_rows, slab_w), jnp.float32),
        grid=grid,
        in_specs=[pl.BlockSpec((2, slab_w), lambda i: (0, 0))],
        out_specs=pl.BlockSpec((tile_rows, slab_w), lambda i: (i, 0)),
        compiler_params=pltpu.CompilerParams(
            dimension_semantics=("parallel",),
            vmem_limit_bytes=_VMEM_LIMIT_BYTES,
        ),
        cost_estimate=cost,
    )(ab)

    emb = emb_flat.reshape(flat_rows * k, dim)     # free row-major reshape
    if flat_rows * k != n:
        emb = emb[:n]                              # ragged n: drop padded positions
    return emb[None, :, :]


def make_inv_freq(dim: int) -> jax.Array:
    # Deterministic parameter setup, same as the PyTorch __init__.
    return 1.0 / (10000.0 ** (jnp.arange(0, dim, 2, dtype=jnp.float32) / dim))


def _reference(x: jax.Array, inv_freq: jax.Array) -> jax.Array:
    n = x.shape[-2]
    t = jnp.arange(n, dtype=inv_freq.dtype)
    freqs = jnp.einsum("i,j->ij", t, inv_freq)
    emb = jnp.concatenate((freqs, freqs), axis=-1)
    return emb[None, :, :]


if __name__ == "__main__":
    key = jax.random.PRNGKey(0)

    def _check(x, inv, name):
        out = jax.block_until_ready(sinusoidal_embeddings(x, inv))
        ref = _reference(x, inv)
        assert out.shape == ref.shape, (name, out.shape, ref.shape)
        assert out.dtype == jnp.float32, (name, out.dtype)
        assert jnp.allclose(out, ref, atol=1e-6, rtol=1e-5), f"mismatch ({name})"

    # Primary small case (matches the PyTorch module's typical usage).
    batch, seq, dim = 2, 8, 32
    x = jax.random.normal(key, (batch, seq, dim), dtype=jnp.float32)
    _check(x, make_inv_freq(dim), "small dim=32")

    # Long sequence, dim=64: lane-dense slab, two grid tiles, partial last block.
    _check(jnp.zeros((1, 40000, 64), jnp.float32), make_inv_freq(64), "long dim=64")

    # Ragged n with dim=96 (lcm slab width 384, padded tail sliced in wrapper).
    _check(jnp.zeros((1, 1001, 96), jnp.float32), make_inv_freq(96), "ragged dim=96")

    # dim >= 128 path (natural layout), multiple tiles with a partial last block.
    _check(jnp.zeros((1, 10000, 256), jnp.float32), make_inv_freq(256), "dim=256")

    print("KERNEL_OK")
</pallas_src>

<mosaic_0001>
module attributes {stable_mosaic.version = 11 : i64} {
  func.func @_emb_kernel(%arg0: i32, %arg1: memref<2x128xf32, #tpu.memory_space<vmem>>, %arg2: memref<2x128xf32, #tpu.memory_space<vmem>>) attributes {dimension_semantics = [#tpu.dimension_semantics<parallel>], iteration_bounds = array<i64: 1>, scalar_prefetch = 0 : i64, scratch_operands = 0 : i64, tpu.core_type = #tpu.core_type<tc>, window_params = [{pipeline_mode = #tpu.pipeline_mode<synchronous>, transform_indices = @transform_0, window_bounds = array<i64: 2, 128>}, {transform_indices = @transform_1, window_bounds = array<i64: 2, 128>}]} {
    %c0 = arith.constant 0 : index
    %c0_0 = arith.constant 0 : index
    %0 = vector.load %arg1[%c0, %c0_0] : memref<2x128xf32, #tpu.memory_space<vmem>>, vector<1x128xf32>
    %c2_i32 = arith.constant 2 : i32
    %1 = arith.muli %arg0, %c2_i32 : i32
    %2 = arith.sitofp %1 : i32 to f32
    %3 = vector.broadcast %2 : f32 to vector<1x128xf32>
    %4 = arith.mulf %3, %0 : vector<1x128xf32>
    %c1 = arith.constant 1 : index
    %c0_1 = arith.constant 0 : index
    %5 = vector.load %arg1[%c1, %c0_1] : memref<2x128xf32, #tpu.memory_space<vmem>>, vector<1x128xf32>
    %6 = arith.addf %4, %5 : vector<1x128xf32>
    %7 = tpu.iota {dimensions = array<i32: 0>} : vector<2x128xi32>
    %8 = arith.sitofp %7 : vector<2x128xi32> to vector<2x128xf32>
    %9 = vector.broadcast %0 : vector<1x128xf32> to vector<2x128xf32>
    %10 = arith.mulf %8, %9 : vector<2x128xf32>
    %11 = vector.broadcast %6 : vector<1x128xf32> to vector<2x128xf32>
    %12 = arith.addf %10, %11 : vector<2x128xf32>
    %c0_2 = arith.constant 0 : index
    %c0_3 = arith.constant 0 : index
    %13 = vector.load %arg2[%c0_2, %c0_3] : memref<2x128xf32, #tpu.memory_space<vmem>>, vector<2x128xf32>
    tpu.vector_store %arg2[%c0_2, %c0_3], %12 {strides = array<i32>} : memref<2x128xf32, #tpu.memory_space<vmem>>, vector<2x128xf32>,
    return
  }
  func.func @transform_0(%arg0: i32) -> (i32, i32) {
    %c0_i32 = arith.constant 0 : i32
    %c0_i32_0 = arith.constant 0 : i32
    %c0_i32_1 = arith.constant 0 : i32
    return %c0_i32, %c0_i32_0 : i32, i32
  }
  func.func @transform_1(%arg0: i32) -> (i32, i32) {
    %c0_i32 = arith.constant 0 : i32
    %c0_i32_0 = arith.constant 0 : i32
    return %arg0, %c0_i32 : i32, i32
  }
}

</mosaic_0001>

<bundles_post_ra>
// kernel: tpu_custom_call.1
= control target key start
LH: loop header
LB: loop body
LE: loop exit
PB: predicated region body
PF: predicated region fallthrough
CT: control target
= control target key end

     0   :  { %6 = vsyncpa [#allocation3], 0  ;;  %s121_s0 = inlined_call_operand.hbm [shape: f32[2,128], index: 0, kind: input, shape index: {}]   ;;  %s122_s1 = inlined_call_operand.hbm [shape: f32[2,128], index: 1, kind: output, shape index: {}]  }
   0x1   :  { %7 = vsyncpa [#allocation4], 0  ;;  %s103_s6 = smov [#allocation2]  }
   0x2   :  { %s14_s7 = sshll.u32 %s103_s6, 4  ;;  %s15_s7 = int_to_ptr.vmem [resolvable:$true] %s14_s7 }
   0x3   :  { %s67_s8 = scalar_lea.vmem %s15_s7, 32  ;;  %p72_p1 = scmp.lt.s32.totalorder %s15_s7, %s15_s7 }
   0x4   :  { %p68_p0 = scmp.ne.s32.totalorder %s15_s7, %s67_s8  ;;  %p73_p2 = scmp.lt.s32.totalorder %s67_s8, %s67_s8 }
   0x6   :  { %p74_p3 = por %p73_p2, %p72_p1 }
   0x8   :  { %p75_p4 = pnand %p74_p3, %p68_p0 }
   0xa   :  { %78 = shalt.err (!%p75_p4)
}
   0xb   :  { %17 = dma.hbm_to_vmem [thread:$0]  %s121_s0, 32, %s15_s7, [#allocation3]  }
   0xc   :  { %99 = dma.done.wait [#allocation3], 32  }
   0xd   :  { %100 = vsyncadd [#allocation3], 4294967264  ;;  %v28_v0 = vlaneseq  ;;  %v21_v4 = vld [vmem:[#allocation2] sm:$0x1]  ;;  %v26_v5 = vld [vmem:[#allocation2 + $0x1] sm:$0x1] }
   0xe   :  { %v25_v6 = vmul.f32 0.0, %v21_v4  ;;  %s104_s11 = smov [#allocation5]  }
   0xf   :  { %v29_v1 = vshrl.u32 %v28_v0, 7  ;;  %s48_s12 = sshll.u32 %s104_s11, 4  ;;  %s49_s12 = int_to_ptr.vmem [resolvable:$true] %s48_s12 }
  0x10   :  { %v27_v8 = vadd.f32 %v26_v5, %v25_v6  ;;  %s79_s13 = scalar_lea.vmem %s49_s12, 32  ;;  %p84_p6 = scmp.lt.s32.totalorder %s49_s12, %s49_s12 }
  0x11   :  { %v33_v2 = vsub.s32 0, %v29_v1  ;;  %v30_v3 = vcvt.s32.f32 %v29_v1  ;;  %p80_p5 = scmp.ne.s32.totalorder %s49_s12, %s79_s13  ;;  %p85_p7 = scmp.lt.s32.totalorder %s79_s13, %s79_s13 }
  0x13   :  { %v34_v7 = vrot.slane %v21_v4, %v33_v2  ;;  %v39_v10 = vrot.slane %v27_v8, %v33_v2  ;;  %p86_p8 = por %p85_p7, %p84_p6 }
  0x15   :  { %v35_v9 = vmul.f32 %v34_v7, %v30_v3  ;;  %p87_p9 = pnand %p86_p8, %p80_p5 }
  0x17   :  { %v40_v11 = vadd.f32 %v39_v10, %v35_v9 }
  0x19   :  { %41 = vst [vmem:[#allocation5] sm:$0x3] %v40_v11 }
  0x1a   :  { %90 = shalt.err (!%p87_p9)
}
  0x1b   :  { %51 = dma.vmem_to_hbm [thread:$0]  %s49_s12, 32, %s122_s1, [#allocation4]  }
  0x1c   :  { %101 = dma.done.wait [#allocation4], 32  }
  0x1d   :  { %102 = vsyncadd [#allocation4], 4294967264 }
  0x1e   :  { %55 = vsyncpa [#allocation3], 1 }
  0x1f   :  { %56 = vsyncpa [#allocation4], 1 }

</bundles_post_ra>
